<compile_context>
chip_gen: v5e
topology: v5e:2x2
jax: 0.10.0
libtpu: 0.0.40
codegen_flags: <defaults>
</compile_context>

<pallas_src>
import jax
import jax.numpy as jnp
from jax.experimental import pallas as pl
from jax.experimental.pallas import tpu as pltpu

LINEAR_HIDDEN = 32   # hard-coded in the module
N_OUT = 2            # hard-coded in the module
PAD = 128            # lane-dense width for the intermediate / output dims
TILE_M = 512         # batch tile for the gridded path (VMEM-safe on v5e/v6e/v7x)
SMALL_BATCH = 256    # at/below this, run a single full-block (no-grid) pass


def _classifier_kernel(x_ref, w1_ref, b1_ref, w2_ref, b2_ref, o_ref):
    # x: [TM, H] bf16, W1: [H, 128] bf16, b1: [1, 128] f32,
    # W2: [128, 128] f32, b2: [1, 128] f32, out: [TM, 128] f32.
    h = jnp.dot(x_ref[...], w1_ref[...], preferred_element_type=jnp.float32)
    h = jnp.maximum(h + b1_ref[...], 0.0)          # bias + ReLU in f32 (lane-dense)
    # Dropout: identity in eval mode (deterministic forward).
    out = jnp.dot(h, w2_ref[...], preferred_element_type=jnp.float32)
    o_ref[...] = (out + b2_ref[...]).astype(o_ref.dtype)


def custom_classifier_forward(pooled, w1, b1, w2, b2):
    """pooled: [batch, hidden] (BERT pooler_output). Returns [batch, 2] f32 logits.

    Weights are stored [in_features, out_features] (transposed from nn.Linear):
    w1 [hidden, 32], b1 [1, 32] (or [32]), w2 [32, 2], b2 [1, 2] (or [2]).
    """
    batch, hidden = pooled.shape

    # Zero-pad intermediate (32 -> 128) and output (2 -> 128) lane dimensions.
    # Padded entries are exactly zero => logits[:, :2] are unchanged.
    w1p = jnp.zeros((hidden, PAD), jnp.bfloat16).at[:, :LINEAR_HIDDEN].set(
        w1.astype(jnp.bfloat16))
    b1p = jnp.zeros((1, PAD), jnp.float32).at[:, :LINEAR_HIDDEN].set(
        b1.reshape(1, LINEAR_HIDDEN).astype(jnp.float32))
    w2p = jnp.zeros((PAD, PAD), jnp.float32).at[:LINEAR_HIDDEN, :N_OUT].set(
        w2.astype(jnp.float32))
    b2p = jnp.zeros((1, PAD), jnp.float32).at[:, :N_OUT].set(
        b2.reshape(1, N_OUT).astype(jnp.float32))

    # bf16 activations halve HBM bytes; MXU takes bf16 natively with f32 accum.
    x = pooled.astype(jnp.bfloat16)

    if batch <= SMALL_BATCH:
        # Tiny batch: everything resident in VMEM, single fused pass, no grid.
        out = pl.pallas_call(
            _classifier_kernel,
            out_shape=jax.ShapeDtypeStruct((batch, PAD), jnp.float32),
            in_specs=[pl.BlockSpec(memory_space=pltpu.VMEM)] * 5,
            out_specs=pl.BlockSpec(memory_space=pltpu.VMEM),
        )(x, w1p, b1p, w2p, b2p)
        return out[:, :N_OUT]

    # Large batch: 1-D grid over batch tiles; weights stay VMEM-resident.
    padded_batch = pl.cdiv(batch, TILE_M) * TILE_M
    if padded_batch != batch:
        x = jnp.pad(x, ((0, padded_batch - batch), (0, 0)))
    grid = (padded_batch // TILE_M,)

    cost = pl.CostEstimate(
        flops=2 * padded_batch * hidden * PAD + 2 * padded_batch * PAD * PAD,
        transcendentals=0,
        bytes_accessed=(padded_batch * hidden * x.dtype.itemsize   # read x (bf16)
                        + padded_batch * PAD * 4                   # write padded logits
                        + hidden * PAD * 2 + PAD * PAD * 4 + 2 * PAD * 4),  # weights
    )

    out = pl.pallas_call(
        _classifier_kernel,
        out_shape=jax.ShapeDtypeStruct((padded_batch, PAD), jnp.float32),
        grid=grid,
        in_specs=[
            pl.BlockSpec((TILE_M, hidden), lambda i: (i, 0)),   # x: batch-tiled
            pl.BlockSpec((hidden, PAD), lambda i: (0, 0)),      # W1: resident
            pl.BlockSpec((1, PAD), lambda i: (0, 0)),           # b1: resident
            pl.BlockSpec((PAD, PAD), lambda i: (0, 0)),         # W2: resident
            pl.BlockSpec((1, PAD), lambda i: (0, 0)),           # b2: resident
        ],
        out_specs=pl.BlockSpec((TILE_M, PAD), lambda i: (i, 0)),
        compiler_params=pltpu.CompilerParams(
            dimension_semantics=("parallel",)),   # use both TCs on v7x
        cost_estimate=cost,
    )(x, w1p, b1p, w2p, b2p)
    return out[:batch, :N_OUT]


def init_params(key, hidden_size, linear_hidden, n_out):
    """Deterministic synthetic init mirroring nn.Linear shapes.

    nn.Linear(H, 32): weight [32, H], bias [32] -> stored here as W1 [H, 32],
    b1 [1, 32]; similarly for the second layer.
    """
    k1, k2, k3, k4 = jax.random.split(key, 4)
    s1 = 1.0 / jnp.sqrt(hidden_size)
    s2 = 1.0 / jnp.sqrt(linear_hidden)
    w1 = jax.random.uniform(k1, (hidden_size, linear_hidden), jnp.float32, -s1, s1)
    b1 = jax.random.uniform(k2, (1, linear_hidden), jnp.float32, -s1, s1)
    w2 = jax.random.uniform(k3, (linear_hidden, n_out), jnp.float32, -s2, s2)
    b2 = jax.random.uniform(k4, (1, n_out), jnp.float32, -s2, s2)
    return w1, b1, w2, b2


if __name__ == "__main__":
    key = jax.random.PRNGKey(0)

    batch = 8
    hidden_size = 128              # small synthetic stand-in for BERT hidden size

    k_x, k_p, k_x2 = jax.random.split(key, 3)
    # Synthetic stand-in for BERT pooler_output (tanh-bounded like the real pooler).
    pooled = jnp.tanh(jax.random.normal(k_x, (batch, hidden_size), jnp.float32))
    w1, b1, w2, b2 = init_params(k_p, hidden_size, LINEAR_HIDDEN, N_OUT)

    # --- small-batch (no-grid) path ---
    logits = custom_classifier_forward(pooled, w1, b1, w2, b2)
    jax.block_until_ready(logits)
    assert logits.shape == (batch, N_OUT)

    # Reference (eval-mode dropout == identity). "Matched" ref replicates the
    # bf16 MXU feed; full-f32 ref bounds the bf16-cast error.
    def ref_fn(x, matched):
        xr = x.astype(jnp.bfloat16) if matched else x
        w1r = w1.astype(jnp.bfloat16) if matched else w1
        h = jnp.dot(xr, w1r, preferred_element_type=jnp.float32) + b1
        h = jnp.maximum(h, 0.0)
        return jnp.dot(h, w2, preferred_element_type=jnp.float32) + b2

    assert jnp.allclose(logits, ref_fn(pooled, True), atol=1e-2, rtol=1e-2)
    assert jnp.allclose(logits, ref_fn(pooled, False), atol=5e-2, rtol=5e-2)

    # --- gridded (large-batch) path, including a ragged remainder tile ---
    big_batch = 600
    pooled_big = jnp.tanh(
        jax.random.normal(k_x2, (big_batch, hidden_size), jnp.float32))
    logits_big = custom_classifier_forward(pooled_big, w1, b1, w2, b2)
    jax.block_until_ready(logits_big)
    assert logits_big.shape == (big_batch, N_OUT)
    assert jnp.allclose(logits_big, ref_fn(pooled_big, True), atol=1e-2, rtol=1e-2)

    print("KERNEL_OK")
</pallas_src>

<mosaic_0001>
module attributes {stable_mosaic.version = 11 : i64} {
  func.func @_classifier_kernel(%arg0: memref<8x128xbf16, #tpu.memory_space<vmem>>, %arg1: memref<128x128xbf16, #tpu.memory_space<vmem>>, %arg2: memref<1x128xf32, #tpu.memory_space<vmem>>, %arg3: memref<128x128xf32, #tpu.memory_space<vmem>>, %arg4: memref<1x128xf32, #tpu.memory_space<vmem>>, %arg5: memref<8x128xf32, #tpu.memory_space<vmem>>) attributes {dimension_semantics = [], scalar_prefetch = 0 : i64, scratch_operands = 0 : i64, tpu.core_type = #tpu.core_type<tc>} {
    %c0 = arith.constant 0 : index
    %c0_0 = arith.constant 0 : index
    %0 = vector.load %arg0[%c0, %c0_0] : memref<8x128xbf16, #tpu.memory_space<vmem>>, vector<8x128xbf16>
    %c0_1 = arith.constant 0 : index
    %c0_2 = arith.constant 0 : index
    %1 = vector.load %arg1[%c0_1, %c0_2] : memref<128x128xbf16, #tpu.memory_space<vmem>>, vector<128x128xbf16>
    %cst = arith.constant dense<0.000000e+00> : vector<8x128xf32>
    %2 = tpu.matmul %0, %1, %cst {dimension_numbers = #tpu.dot_dimension_numbers<[1], [0], [0], [1], [0, 0, 1, 1], [], []>} : vector<8x128xbf16>, vector<128x128xbf16>, vector<8x128xf32> -> vector<8x128xf32>
    %c0_3 = arith.constant 0 : index
    %c0_4 = arith.constant 0 : index
    %3 = vector.load %arg2[%c0_3, %c0_4] : memref<1x128xf32, #tpu.memory_space<vmem>>, vector<1x128xf32>
    %4 = vector.broadcast %3 : vector<1x128xf32> to vector<8x128xf32>
    %5 = arith.addf %2, %4 : vector<8x128xf32>
    %cst_5 = arith.constant 0.000000e+00 : f32
    %6 = vector.broadcast %cst_5 : f32 to vector<8x128xf32>
    %7 = arith.maximumf %5, %6 : vector<8x128xf32>
    %c0_6 = arith.constant 0 : index
    %c0_7 = arith.constant 0 : index
    %8 = vector.load %arg3[%c0_6, %c0_7] : memref<128x128xf32, #tpu.memory_space<vmem>>, vector<128x128xf32>
    %cst_8 = arith.constant dense<0.000000e+00> : vector<8x128xf32>
    %9 = tpu.matmul %7, %8, %cst_8 {dimension_numbers = #tpu.dot_dimension_numbers<[1], [0], [0], [1], [0, 0, 1, 1], [], []>} : vector<8x128xf32>, vector<128x128xf32>, vector<8x128xf32> -> vector<8x128xf32>
    %c0_9 = arith.constant 0 : index
    %c0_10 = arith.constant 0 : index
    %10 = vector.load %arg4[%c0_9, %c0_10] : memref<1x128xf32, #tpu.memory_space<vmem>>, vector<1x128xf32>
    %11 = vector.broadcast %10 : vector<1x128xf32> to vector<8x128xf32>
    %12 = arith.addf %9, %11 : vector<8x128xf32>
    %c0_11 = arith.constant 0 : index
    %c0_12 = arith.constant 0 : index
    %13 = vector.load %arg5[%c0_11, %c0_12] : memref<8x128xf32, #tpu.memory_space<vmem>>, vector<8x128xf32>
    tpu.vector_store %arg5[%c0_11, %c0_12], %12 {strides = array<i32>} : memref<8x128xf32, #tpu.memory_space<vmem>>, vector<8x128xf32>,
    return
  }
}

</mosaic_0001>

<bundles_post_ra>
// kernel: tpu_custom_call.1
= control target key start
LH: loop header
LB: loop body
LE: loop exit
PB: predicated region body
PF: predicated region fallthrough
CT: control target
= control target key end

     0   :  { %10 = vsyncpa [#allocation3], 0  ;;  %s416_s0 = inlined_call_operand.hbm [shape: bf16[8,128], index: 0, kind: input, shape index: {}]   ;;  %s417_s1 = inlined_call_operand.hbm [shape: bf16[128,128], index: 1, kind: input, shape index: {}]   ;;  %s418_s2 = inlined_call_operand.vmem [shape: f32[1,128], index: 2, kind: input, shape index: {}]   ;;  %s419_s3 = inlined_call_operand.hbm [shape: f32[128,128], index: 3, kind: input, shape index: {}]   ;;  %s420_s4 = inlined_call_operand.vmem [shape: f32[1,128], index: 4, kind: input, shape index: {}]   ;;  %s421_s5 = inlined_call_operand.hbm [shape: f32[8,128], index: 5, kind: output, shape index: {}]  }
   0x1   :  { %11 = vsyncpa [#allocation6], 0  ;;  %s28_s20 = sshll.u32 %s417_s1, 4  ;;  %s29_s20 = int_to_ptr.hbm [resolvable:$true] %s28_s20 }
   0x2   :  { %12 = vsyncpa [#allocation4], 0  ;;  %s360_s21 = smov [#allocation5]   ;;  %s18_s25 = sshll.u32 %s416_s0, 4  ;;  %s19_s25 = int_to_ptr.hbm [resolvable:$true] %s18_s25 }
   0x3   :  { %s30_s22 = sshll.u32 %s360_s21, 4  ;;  %s361_s26 = smov 64   ;;  %s31_s22 = int_to_ptr.vmem [resolvable:$true] %s30_s22 }
   0x4   :  { %s362_s27 = smov 4   ;;  %s363_s28 = smov [#allocation2]  }
   0x5   :  { %36 = dma.hbm_to_vmem [thread:$0]  %s29_s20, 1024, %s31_s22, [#allocation6], %s361_s26, %s361_s26, %s362_s27  }
   0x6   :  { %s20_s29 = sshll.u32 %s363_s28, 4  ;;  %s43_s7 = sshll.u32 %s419_s3, 4  ;;  %s21_s29 = int_to_ptr.vmem [resolvable:$true] %s20_s29  ;;  %s44_s7 = int_to_ptr.hbm [resolvable:$true] %s43_s7 }
   0x7   :  { %23 = dma.hbm_to_vmem [thread:$0]  %s19_s25, 64, %s21_s29, [#allocation3]  }
   0x8   :  { %s364_s1 = smov [#allocation7]   ;;  %s365_s9 = smov 128  }
   0x9   :  { %s45_s8 = sshll.u32 %s364_s1, 4  ;;  %s366_s10 = smov 8   ;;  %s46_s8 = int_to_ptr.vmem [resolvable:$true] %s45_s8 }
   0xa   :  { %51 = dma.hbm_to_vmem [thread:$0]  %s44_s7, 2048, %s46_s8, [#allocation6], %s365_s9, %s365_s9, %s366_s10  }
   0xb   :  { %354 = dma.done.wait [#allocation3], 64  }
   0xc   :  { %355 = vsyncadd [#allocation3], 4294967232 }
   0xd   :  { %356 = dma.done.wait [#allocation6], 3072  }
   0xe   :  { %357 = vsyncadd [#allocation6], 4294964224  ;;  %v247_v0 = vld [vmem:[#allocation5 + $0x38] sm:$0xff]  ;;  %v246_v1 = vld [vmem:[#allocation5 + $0x30] sm:$0xff]  ;;  %s367_s13 = smov [#allocation8]   ;;  %s197_s17 = sshll.u32 %s421_s5, 4  ;;  %s198_s17 = int_to_ptr.hbm [resolvable:$true] %s197_s17 }
   0xf   :  { %135 = vmatpush.bf16.msra.mxu0 %v247_v0  ;;  %v164_v2 = vld [vmem:[#allocation7 + $0x78] sm:$0xff]  ;;  %v163_v3 = vld [vmem:[#allocation7 + $0x70] sm:$0xff]  ;;  %v162_v4 = vld [vmem:[#allocation7 + $0x68] sm:$0xff]  ;;  %s195_s14 = sshll.u32 %s367_s13, 4  ;;  %s196_s14 = int_to_ptr.vmem [resolvable:$true] %s195_s14 }
  0x10   :  { %169 = vmatpush.msra.mxu1 %v164_v2  ;;  %v245_v5 = vld [vmem:[#allocation5 + $0x28] sm:$0xff]  ;;  %v161_v6 = vld [vmem:[#allocation7 + $0x60] sm:$0xff]  ;;  %v160_v7 = vld [vmem:[#allocation7 + $0x58] sm:$0xff] }
  0x11   :  { %v244_v8 = vld [vmem:[#allocation5 + $0x20] sm:$0xff]  ;;  %v159_v9 = vld [vmem:[#allocation7 + $0x50] sm:$0xff]  ;;  %v158_v10 = vld [vmem:[#allocation7 + $0x48] sm:$0xff] }
  0x12   :  { %170 = vmatpush.msra.mxu1 %v163_v3  ;;  %v243_v11 = vld [vmem:[#allocation5 + $0x18] sm:$0xff]  ;;  %v157_v12 = vld [vmem:[#allocation7 + $0x40] sm:$0xff]  ;;  %v242_v14 = vld [vmem:[#allocation5 + $0x10] sm:$0xff] }
  0x13   :  { %136 = vmatpush.bf16.msra.mxu0 %v246_v1  ;;  %v156_v13 = vld [vmem:[#allocation7 + $0x38] sm:$0xff]  ;;  %v155_v15 = vld [vmem:[#allocation7 + $0x30] sm:$0xff]  ;;  %v154_v16 = vld [vmem:[#allocation7 + $0x28] sm:$0xff] }
  0x14   :  { %171 = vmatpush.msra.mxu1 %v162_v4  ;;  %v241_v17 = vld [vmem:[#allocation5 + $0x8] sm:$0xff]  ;;  %v153_v18 = vld [vmem:[#allocation7 + $0x20] sm:$0xff]  ;;  %v152_v19 = vld [vmem:[#allocation7 + $0x18] sm:$0xff] }
  0x15   :  { %v240_v20 = vld [vmem:[#allocation5] sm:$0xff]  ;;  %v66_v21 = vld [vmem:[#allocation2] sm:$0xf]  ;;  %v151_v22 = vld [vmem:[#allocation7 + $0x10] sm:$0xff] }
  0x16   :  { %172 = vmatpush.msra.mxu1 %v161_v6  ;;  %v150_v23 = vld [vmem:[#allocation7 + $0x8] sm:$0xff]  ;;  %v149_v24 = vld [vmem:[#allocation7] sm:$0xff]  ;;  %v256_v25 = vld [vmem:[%s418_s2] ss:$0 sm:$0xff] }
  0x17   :  { %137 = vmatpush.bf16.msra.mxu0 %v245_v5  ;;  %v257_v30 = vld [vmem:[%s420_s4] ss:$0 sm:$0xff] }
  0x18   :  { %173 = vmatpush.msra.mxu1 %v160_v7 }
  0x1a   :  { %174 = vmatpush.msra.mxu1 %v159_v9 }
  0x1b   :  { %138 = vmatpush.bf16.msra.mxu0 %v244_v8 }
  0x1c   :  { %175 = vmatpush.msra.mxu1 %v158_v10 }
  0x1e   :  { %176 = vmatpush.msra.mxu1 %v157_v12 }
  0x1f   :  { %139 = vmatpush.bf16.msra.mxu0 %v243_v11 }
  0x20   :  { %177 = vmatpush.msra.mxu1 %v156_v13 }
  0x22   :  { %178 = vmatpush.msra.mxu1 %v155_v15 }
  0x23   :  { %140 = vmatpush.bf16.msra.mxu0 %v242_v14 }
  0x24   :  { %179 = vmatpush.msra.mxu1 %v154_v16 }
  0x26   :  { %180 = vmatpush.msra.mxu1 %v153_v18 }
  0x27   :  { %141 = vmatpush.bf16.msra.mxu0 %v241_v17 }
  0x28   :  { %181 = vmatpush.msra.mxu1 %v152_v19 }
  0x2a   :  { %182 = vmatpush.msra.mxu1 %v151_v22 }
  0x2b   :  { %142 = vmatpush.bf16.msra.mxu0 %v240_v20 }
  0x2c   :  { %183 = vmatpush.msra.mxu1 %v150_v23 }
  0x2e   :  { %143 = vmatmul.bf16.vlgmr.msra.gmra.mxu0 %v66_v21  ;;  %184 = vmatpush.msra.mxu1 %v149_v24 }
  0xab   :  { %v144_v26 = vpop.f32.mrf.mxu0 }
  0xac   :  { %v145_v27 = vadd.f32 %v256_v25, %v144_v26 }
  0xae   :  { %v148_v28 = vmax.f32 %v145_v27, 0.0 }
  0xb0   :  { %185 = vmatmul.f32.vlgmr.msra.gmra.mxu1 %v148_v28 }
  0xb3   :  { %v146_v29 = vpop.f32.mrf.mxu0 }
 0x12d   :  { %v186_v31 = vpop.f32.mrf.mxu1 }
 0x12e   :  { %v187_v32 = vadd.f32 %v257_v30, %v186_v31 }
 0x130   :  { %189 = vst [vmem:[#allocation8] sm:$0xff] %v187_v32 }
 0x131   :  { %200 = dma.vmem_to_hbm [thread:$0]  %s196_s14, 128, %s198_s17, [#allocation4]  }
 0x132   :  { %358 = dma.done.wait [#allocation4], 128  }
 0x133   :  { %359 = vsyncadd [#allocation4], 4294967168 }
 0x134   :  { %205 = vsyncpa [#allocation3], 1 }
 0x135   :  { %206 = vsyncpa [#allocation6], 1 }
 0x136   :  { %207 = vsyncpa [#allocation4], 1 }

</bundles_post_ra>
